<compile_context>
chip_gen: v6e
topology: v6e:2x2x1
jax: 0.10.0
libtpu: 0.0.40
codegen_flags: <defaults>
</compile_context>

<pallas_src>
import functools

import jax
import jax.numpy as jnp
from jax.experimental import pallas as pl
from jax.experimental.pallas import tpu as pltpu


# --------------------------------------------------------------------------- #
# Kernel
# --------------------------------------------------------------------------- #
def _attn_gate_kernel(tf_ref, envp_ref, wt_ref, o_ref,
                      q_scr, g_scr, m_scr, l_scr, acc_scr, *,
                      p_sec, kv_block, scale, compute_dtype, approx_recip):
    kv = pl.program_id(1)
    bt, S, dm = tf_ref.shape

    wt = wt_ref[...].astype(compute_dtype)            # (d_model, d_out_pad)

    @pl.when(kv == 0)
    def _():
        # Project queries + gate once per batch block; init online softmax.
        x = tf_ref[...].astype(compute_dtype).reshape(bt * S, dm)
        proj = jnp.dot(x, wt, preferred_element_type=jnp.float32)
        proj = proj.reshape(bt, S, -1) + envp_ref[...]        # env + fused bias
        q_scr[...] = proj[..., 0:p_sec].astype(compute_dtype)
        g_scr[...] = jax.nn.sigmoid(proj[..., 3 * p_sec:3 * p_sec + 1])
        m_scr[...] = jnp.full_like(m_scr, -jnp.inf)
        l_scr[...] = jnp.zeros_like(l_scr)
        acc_scr[...] = jnp.zeros_like(acc_scr)

    # Project this KV tile (keys/values) from the resident time_features block.
    start = pl.multiple_of(kv * kv_block, kv_block)
    xkv = tf_ref[:, pl.ds(start, kv_block), :].astype(compute_dtype)
    proj_kv = jnp.dot(xkv.reshape(bt * kv_block, dm), wt,
                      preferred_element_type=jnp.float32)
    proj_kv = proj_kv.reshape(bt, kv_block, -1) + envp_ref[...]
    k = proj_kv[..., p_sec:2 * p_sec].astype(compute_dtype)     # lane-aligned
    v = proj_kv[..., 2 * p_sec:3 * p_sec].astype(compute_dtype)

    # Gated scores for this tile; gate is per (batch, query) row so it only
    # rescales the row and is compatible with online softmax.
    s = jnp.einsum('bqd,bkd->bqk', q_scr[...], k,
                   preferred_element_type=jnp.float32)
    s = s * (g_scr[...] * scale)

    # Online softmax update (f32 throughout).
    m_new = jnp.maximum(m_scr[...], jnp.max(s, axis=-1, keepdims=True))
    corr = jnp.exp(m_scr[...] - m_new)
    e = jnp.exp(s - m_new)
    l_scr[...] = corr * l_scr[...] + jnp.sum(e, axis=-1, keepdims=True)
    acc_scr[...] = corr * acc_scr[...] + jnp.einsum(
        'bqk,bkd->bqd', e.astype(compute_dtype), v,
        preferred_element_type=jnp.float32)
    m_scr[...] = m_new

    @pl.when(kv == pl.num_programs(1) - 1)
    def _():
        inv_l = pl.reciprocal(l_scr[...], approx=approx_recip)
        o_ref[...] = (acc_scr[...] * inv_l).astype(o_ref.dtype)   # full-lane store


# --------------------------------------------------------------------------- #
# Wrapper helpers
# --------------------------------------------------------------------------- #
def _device_kind():
    try:
        return jax.devices()[0].device_kind.lower()
    except Exception:
        return ""


def _round_up(x, m):
    return ((x + m - 1) // m) * m


def _divisors_desc(n):
    return [d for d in range(n, 0, -1) if n % d == 0]


def _block_vmem_bytes(bt, S, tk, d_model, d_out_pad, p_sec, cbytes):
    """Rough per-grid-step VMEM estimate (blocks + scratch + live temporaries)."""
    f = 4
    blocks = (2 * bt * S * d_model * f          # time_features (double-buffered)
              + 2 * bt * d_out_pad * f          # env_proj
              + 2 * d_model * d_out_pad * f     # fused weight
              + 2 * bt * S * p_sec * f)         # output
    scratch = bt * S * p_sec * (f + cbytes) + 3 * bt * S * f
    temps = (bt * tk * d_out_pad * f            # proj_kv
             + 3 * bt * S * tk * f              # scores / exp live copies
             + 2 * bt * tk * p_sec * cbytes)    # k, v
    return blocks + scratch + temps


def _default_blocking(B, S, d_model, d_out_pad, p_sec, kind, cbytes):
    multi_tc = any(t in kind for t in ("v7", "v5p", "v4"))
    budget = (24 << 20) if "v7" in kind else (64 << 20)
    bt_cap = B // 2 if (multi_tc and B >= 2) else B      # >=2 steps only on 2-TC chips
    kv_opts = [t for t in _divisors_desc(S) if t == S or t % 8 == 0]
    for bt in [d for d in _divisors_desc(B) if d <= bt_cap]:
        for tk in kv_opts:
            if _block_vmem_bytes(bt, S, tk, d_model, d_out_pad, p_sec, cbytes) <= budget:
                return bt, tk
    return 1, kv_opts[-1]


# --------------------------------------------------------------------------- #
# Public wrapper
# --------------------------------------------------------------------------- #
def self_attention_with_gate(time_features, env_info, params, *, d_model,
                             batch_block=None, kv_block=None,
                             compute_dtype=None, out_dtype=jnp.float32,
                             approx_reciprocal=True):
    """time_features: (B, S, d_model) f32; env_info: (B, time_data_shape) f32."""
    B, S, dm = time_features.shape
    assert dm == d_model
    tds = env_info.shape[-1]
    d_half = d_model // 2
    d_in = d_model + tds

    kind = _device_kind()
    if compute_dtype is None:
        compute_dtype = jnp.bfloat16 if ("v6" in kind or "v7" in kind) else jnp.float32
    cbytes = jnp.dtype(compute_dtype).itemsize

    wq, bq, wk, bk, wv, bv, wg, bg = params

    # Fused, lane-aligned projection weight: q|k|v sections padded to 128-lane
    # boundaries, gate gets its own 128-lane section.  Padded columns are zero
    # so the math is unchanged.  (In a real model this fusion would be built
    # once at parameter-load time, not per call.)
    p_sec = max(128, _round_up(d_half, 128))
    d_out_pad = 3 * p_sec + 128
    w_fused = jnp.zeros((d_in, d_out_pad), jnp.float32)
    w_fused = w_fused.at[:, 0:d_half].set(wq.astype(jnp.float32))
    w_fused = w_fused.at[:, p_sec:p_sec + d_half].set(wk.astype(jnp.float32))
    w_fused = w_fused.at[:, 2 * p_sec:2 * p_sec + d_half].set(wv.astype(jnp.float32))
    w_fused = w_fused.at[:, 3 * p_sec:3 * p_sec + 1].set(wg.astype(jnp.float32))
    b_fused = jnp.zeros((d_out_pad,), jnp.float32)
    b_fused = b_fused.at[0:d_half].set(bq)
    b_fused = b_fused.at[p_sec:p_sec + d_half].set(bk)
    b_fused = b_fused.at[2 * p_sec:2 * p_sec + d_half].set(bv)
    b_fused = b_fused.at[3 * p_sec:3 * p_sec + 1].set(bg)

    w_top = w_fused[:d_model]                                    # rows for time_features
    # Env contribution + fused bias, computed once in XLA (rank-1 per batch row).
    env_proj = env_info.astype(jnp.float32) @ w_fused[d_model:] + b_fused
    env_proj = env_proj[:, None, :]                              # (B, 1, d_out_pad)

    bt_def, tk_def = _default_blocking(B, S, d_model, d_out_pad, p_sec, kind, cbytes)
    bt = batch_block if batch_block is not None else bt_def
    tk = kv_block if kv_block is not None else tk_def
    assert B % bt == 0, "batch must be divisible by batch_block"
    assert S % tk == 0, "seq_len must be divisible by kv_block"
    # TODO(synk): add padded-key masking if S % kv_block padding is ever allowed.
    n_b, n_kv = B // bt, S // tk

    est = _block_vmem_bytes(bt, S, tk, d_model, d_out_pad, p_sec, cbytes)
    vmem_limit = None
    if est > (24 << 20):                                         # above default scoped limit
        cap = (48 << 20) if "v7" in kind else (100 << 20)
        vmem_limit = min(int(est * 1.5), cap)

    kernel = functools.partial(
        _attn_gate_kernel, p_sec=p_sec, kv_block=tk,
        scale=float(1.0 / (d_model ** 0.5)),
        compute_dtype=compute_dtype, approx_recip=approx_reciprocal)

    out_pad = pl.pallas_call(
        kernel,
        out_shape=jax.ShapeDtypeStruct((B, S, p_sec), out_dtype),
        grid_spec=pltpu.PrefetchScalarGridSpec(
            num_scalar_prefetch=0,
            grid=(n_b, n_kv),
            in_specs=[
                pl.BlockSpec((bt, S, d_model), lambda b, kv: (b, 0, 0)),     # time_features
                pl.BlockSpec((bt, 1, d_out_pad), lambda b, kv: (b, 0, 0)),   # env_proj
                pl.BlockSpec((d_model, d_out_pad), lambda b, kv: (0, 0)),    # fused weight
            ],
            out_specs=pl.BlockSpec((bt, S, p_sec), lambda b, kv: (b, 0, 0)),
            scratch_shapes=[
                pltpu.VMEM((bt, S, p_sec), compute_dtype),   # Q
                pltpu.VMEM((bt, S, 1), jnp.float32),         # gate
                pltpu.VMEM((bt, S, 1), jnp.float32),         # m (online max)
                pltpu.VMEM((bt, S, 1), jnp.float32),         # l (online sum)
                pltpu.VMEM((bt, S, p_sec), jnp.float32),     # acc
            ]),
        compiler_params=pltpu.CompilerParams(
            dimension_semantics=("parallel", "arbitrary"),
            vmem_limit_bytes=vmem_limit),
    )(time_features, env_proj, w_top)

    # Strip lane padding (columns >= d_half are exactly zero).
    return out_pad[..., :d_half]


# --------------------------------------------------------------------------- #
# Pure-JAX reference (mirrors the PyTorch forward)
# --------------------------------------------------------------------------- #
def _reference(time_features, env_info, params, *, d_model):
    B, S, _ = time_features.shape
    tds = env_info.shape[-1]
    env_exp = jnp.broadcast_to(env_info[:, None, :], (B, S, tds))
    x = jnp.concatenate([time_features, env_exp], axis=2)
    wq, bq, wk, bk, wv, bv, wg, bg = params
    q = x @ wq + bq
    k = x @ wk + bk
    v = x @ wv + bv
    gate = jax.nn.sigmoid(x @ wg + bg)
    scores = jnp.einsum("bqd,bkd->bqk", q, k) / jnp.sqrt(jnp.float32(d_model))
    gated = scores * gate
    attn = jax.nn.softmax(gated, axis=-1)
    return jnp.einsum("bqk,bkd->bqd", attn, v)


if __name__ == "__main__":
    B, d_model, tds = 2, 32, 16
    d_in = d_model + tds
    d_half = d_model // 2

    key = jax.random.PRNGKey(0)
    ks = jax.random.split(key, 12)

    init_scale = 1.0 / (d_in ** 0.5)
    wq = jax.random.uniform(ks[0], (d_in, d_half), jnp.float32, -init_scale, init_scale)
    bq = jax.random.uniform(ks[1], (d_half,), jnp.float32, -init_scale, init_scale)
    wk = jax.random.uniform(ks[2], (d_in, d_half), jnp.float32, -init_scale, init_scale)
    bk = jax.random.uniform(ks[3], (d_half,), jnp.float32, -init_scale, init_scale)
    wv = jax.random.uniform(ks[4], (d_in, d_half), jnp.float32, -init_scale, init_scale)
    bv = jax.random.uniform(ks[5], (d_half,), jnp.float32, -init_scale, init_scale)
    wg = jax.random.uniform(ks[6], (d_in, 1), jnp.float32, -init_scale, init_scale)
    bg = jax.random.uniform(ks[7], (1,), jnp.float32, -init_scale, init_scale)
    params = (wq, bq, wk, bk, wv, bv, wg, bg)

    # --- Config 1: toy shape, single KV tile, f32 compute (tight tolerance). ---
    S = 8
    tf1 = jax.random.normal(ks[8], (B, S, d_model), jnp.float32)
    env1 = jax.random.normal(ks[9], (B, tds), jnp.float32)
    out1 = jax.block_until_ready(self_attention_with_gate(
        tf1, env1, params, d_model=d_model, compute_dtype=jnp.float32))
    ref1 = _reference(tf1, env1, params, d_model=d_model)
    assert out1.shape == (B, S, d_half)
    assert jnp.allclose(out1, ref1, atol=2e-3, rtol=2e-3), (
        f"cfg1 max abs err {float(jnp.max(jnp.abs(out1 - ref1)))}")

    # --- Config 2: two KV tiles -> exercises the online-softmax path, f32. ---
    S2 = 16
    tf2 = jax.random.normal(ks[10], (B, S2, d_model), jnp.float32)
    env2 = jax.random.normal(ks[11], (B, tds), jnp.float32)
    out2 = jax.block_until_ready(self_attention_with_gate(
        tf2, env2, params, d_model=d_model, batch_block=1, kv_block=8,
        compute_dtype=jnp.float32))
    ref2 = _reference(tf2, env2, params, d_model=d_model)
    assert out2.shape == (B, S2, d_half)
    assert jnp.allclose(out2, ref2, atol=2e-3, rtol=2e-3), (
        f"cfg2 max abs err {float(jnp.max(jnp.abs(out2 - ref2)))}")

    # --- Config 3: generation-default compute dtype (bf16 on v6e/v7x). ---
    out3 = jax.block_until_ready(self_attention_with_gate(
        tf2, env2, params, d_model=d_model, kv_block=8))
    assert jnp.allclose(out3, ref2, atol=1e-1, rtol=1e-1), (
        f"cfg3 max abs err {float(jnp.max(jnp.abs(out3 - ref2)))}")

    print("KERNEL_OK")
</pallas_src>

<mosaic_0001>
module attributes {stable_mosaic.version = 11 : i64} {
  func.func @_attn_gate_kernel(%arg0: i32, %arg1: i32, %arg2: memref<2x8x32xf32, #tpu.memory_space<vmem>>, %arg3: memref<2x1x512xf32, #tpu.memory_space<vmem>>, %arg4: memref<32x512xf32, #tpu.memory_space<vmem>>, %arg5: memref<2x8x128xf32, #tpu.memory_space<vmem>>, %arg6: memref<2x8x128xf32, #tpu.memory_space<vmem>>, %arg7: memref<2x8x1xf32, #tpu.memory_space<vmem>>, %arg8: memref<2x8x1xf32, #tpu.memory_space<vmem>>, %arg9: memref<2x8x1xf32, #tpu.memory_space<vmem>>, %arg10: memref<2x8x128xf32, #tpu.memory_space<vmem>>) attributes {dimension_semantics = [#tpu.dimension_semantics<parallel>, #tpu.dimension_semantics<arbitrary>], iteration_bounds = array<i64: 1, 1>, scalar_prefetch = 0 : i64, scratch_operands = 5 : i64, tpu.core_type = #tpu.core_type<tc>, window_params = [{transform_indices = @transform_0, window_bounds = array<i64: 2, 8, 32>}, {transform_indices = @transform_1, window_bounds = array<i64: 2, 1, 512>}, {pipeline_mode = #tpu.pipeline_mode<synchronous>, transform_indices = @transform_2, window_bounds = array<i64: 32, 512>}, {transform_indices = @transform_3, window_bounds = array<i64: 2, 8, 128>}]} {
    %c0 = arith.constant 0 : index
    %c0_0 = arith.constant 0 : index
    %0 = vector.load %arg4[%c0, %c0_0] : memref<32x512xf32, #tpu.memory_space<vmem>>, vector<32x512xf32>
    %c0_i32 = arith.constant 0 : i32
    %1 = arith.cmpi eq, %arg1, %c0_i32 : i32
    %2 = arith.extui %1 : i1 to i32
    %c0_i32_1 = arith.constant 0 : i32
    %3 = arith.cmpi ne, %2, %c0_i32_1 : i32
    scf.if %3 {
      %c0_41 = arith.constant 0 : index
      %c0_42 = arith.constant 0 : index
      %c0_43 = arith.constant 0 : index
      %49 = vector.load %arg2[%c0_41, %c0_42, %c0_43] : memref<2x8x32xf32, #tpu.memory_space<vmem>>, vector<2x8x32xf32>
      %50 = vector.shape_cast %49 : vector<2x8x32xf32> to vector<16x32xf32>
      %cst_44 = arith.constant dense<0.000000e+00> : vector<16x512xf32>
      %51 = tpu.matmul %50, %0, %cst_44 {dimension_numbers = #tpu.dot_dimension_numbers<[1], [0], [0], [1], [0, 0, 1, 1], [], []>} : vector<16x32xf32>, vector<32x512xf32>, vector<16x512xf32> -> vector<16x512xf32>
      %52 = vector.shape_cast %51 : vector<16x512xf32> to vector<2x8x512xf32>
      %c0_45 = arith.constant 0 : index
      %c0_46 = arith.constant 0 : index
      %c0_47 = arith.constant 0 : index
      %53 = vector.load %arg3[%c0_45, %c0_46, %c0_47] : memref<2x1x512xf32, #tpu.memory_space<vmem>>, vector<2x1x512xf32>
      %54 = vector.broadcast %53 : vector<2x1x512xf32> to vector<2x8x512xf32>
      %55 = arith.addf %52, %54 : vector<2x8x512xf32>
      %56 = vector.extract_strided_slice %55 {offsets = [0, 0, 0], sizes = [2, 8, 128], strides = [1, 1, 1]} : vector<2x8x512xf32> to vector<2x8x128xf32>
      %c0_48 = arith.constant 0 : index
      %c0_49 = arith.constant 0 : index
      %c0_50 = arith.constant 0 : index
      %57 = vector.load %arg6[%c0_48, %c0_49, %c0_50] : memref<2x8x128xf32, #tpu.memory_space<vmem>>, vector<2x8x128xf32>
      tpu.vector_store %arg6[%c0_48, %c0_49, %c0_50], %56 {strides = array<i32>} : memref<2x8x128xf32, #tpu.memory_space<vmem>>, vector<2x8x128xf32>,
      %58 = vector.extract_strided_slice %55 {offsets = [0, 0, 384], sizes = [2, 8, 1], strides = [1, 1, 1]} : vector<2x8x512xf32> to vector<2x8x1xf32>
      %59 = arith.negf %58 : vector<2x8x1xf32>
      %60 = math.exp %59 : vector<2x8x1xf32>
      %cst_51 = arith.constant 1.000000e+00 : f32
      %61 = vector.broadcast %cst_51 : f32 to vector<2x8x1xf32>
      %62 = arith.addf %61, %60 : vector<2x8x1xf32>
      %63 = arith.divf %61, %62 : vector<2x8x1xf32>
      %c0_52 = arith.constant 0 : index
      %c0_53 = arith.constant 0 : index
      %c0_54 = arith.constant 0 : index
      %64 = vector.load %arg7[%c0_52, %c0_53, %c0_54] : memref<2x8x1xf32, #tpu.memory_space<vmem>>, vector<2x8x1xf32>
      tpu.vector_store %arg7[%c0_52, %c0_53, %c0_54], %63 {strides = array<i32>} : memref<2x8x1xf32, #tpu.memory_space<vmem>>, vector<2x8x1xf32>,
      %cst_55 = arith.constant 0xFF800000 : f32
      %65 = vector.broadcast %cst_55 : f32 to vector<2x8x1xf32>
      %c0_56 = arith.constant 0 : index
      %c0_57 = arith.constant 0 : index
      %c0_58 = arith.constant 0 : index
      %66 = vector.load %arg8[%c0_56, %c0_57, %c0_58] : memref<2x8x1xf32, #tpu.memory_space<vmem>>, vector<2x8x1xf32>
      tpu.vector_store %arg8[%c0_56, %c0_57, %c0_58], %65 {strides = array<i32>} : memref<2x8x1xf32, #tpu.memory_space<vmem>>, vector<2x8x1xf32>,
      %cst_59 = arith.constant 0.000000e+00 : f32
      %67 = vector.broadcast %cst_59 : f32 to vector<2x8x1xf32>
      %c0_60 = arith.constant 0 : index
      %c0_61 = arith.constant 0 : index
      %c0_62 = arith.constant 0 : index
      %68 = vector.load %arg9[%c0_60, %c0_61, %c0_62] : memref<2x8x1xf32, #tpu.memory_space<vmem>>, vector<2x8x1xf32>
      tpu.vector_store %arg9[%c0_60, %c0_61, %c0_62], %67 {strides = array<i32>} : memref<2x8x1xf32, #tpu.memory_space<vmem>>, vector<2x8x1xf32>,
      %cst_63 = arith.constant 0.000000e+00 : f32
      %69 = vector.broadcast %cst_63 : f32 to vector<2x8x128xf32>
      %c0_64 = arith.constant 0 : index
      %c0_65 = arith.constant 0 : index
      %c0_66 = arith.constant 0 : index
      %70 = vector.load %arg10[%c0_64, %c0_65, %c0_66] : memref<2x8x128xf32, #tpu.memory_space<vmem>>, vector<2x8x128xf32>
      tpu.vector_store %arg10[%c0_64, %c0_65, %c0_66], %69 {strides = array<i32>} : memref<2x8x128xf32, #tpu.memory_space<vmem>>, vector<2x8x128xf32>,
    } else {
    }
    %c8_i32 = arith.constant 8 : i32
    %4 = arith.muli %arg1, %c8_i32 : i32
    %5 = tpu.assume_multiple %4, 8 : i32
    %c0_2 = arith.constant 0 : index
    %6 = arith.index_cast %5 : i32 to index
    %c0_3 = arith.constant 0 : index
    %7 = vector.load %arg2[%c0_2, %6, %c0_3] : memref<2x8x32xf32, #tpu.memory_space<vmem>>, vector<2x8x32xf32>
    %8 = vector.shape_cast %7 : vector<2x8x32xf32> to vector<16x32xf32>
    %cst = arith.constant dense<0.000000e+00> : vector<16x512xf32>
    %9 = tpu.matmul %8, %0, %cst {dimension_numbers = #tpu.dot_dimension_numbers<[1], [0], [0], [1], [0, 0, 1, 1], [], []>} : vector<16x32xf32>, vector<32x512xf32>, vector<16x512xf32> -> vector<16x512xf32>
    %10 = vector.shape_cast %9 : vector<16x512xf32> to vector<2x8x512xf32>
    %c0_4 = arith.constant 0 : index
    %c0_5 = arith.constant 0 : index
    %c0_6 = arith.constant 0 : index
    %11 = vector.load %arg3[%c0_4, %c0_5, %c0_6] : memref<2x1x512xf32, #tpu.memory_space<vmem>>, vector<2x1x512xf32>
    %12 = vector.broadcast %11 : vector<2x1x512xf32> to vector<2x8x512xf32>
    %13 = arith.addf %10, %12 : vector<2x8x512xf32>
    %14 = vector.extract_strided_slice %13 {offsets = [0, 0, 128], sizes = [2, 8, 128], strides = [1, 1, 1]} : vector<2x8x512xf32> to vector<2x8x128xf32>
    %15 = vector.extract_strided_slice %13 {offsets = [0, 0, 256], sizes = [2, 8, 128], strides = [1, 1, 1]} : vector<2x8x512xf32> to vector<2x8x128xf32>
    %c0_7 = arith.constant 0 : index
    %c0_8 = arith.constant 0 : index
    %c0_9 = arith.constant 0 : index
    %16 = vector.load %arg6[%c0_7, %c0_8, %c0_9] : memref<2x8x128xf32, #tpu.memory_space<vmem>>, vector<2x8x128xf32>
    "tpu.trace_start"() <{level = 10 : i32, message = "bqd,bkd->bqk"}> : () -> ()
    %cst_10 = arith.constant dense<0.000000e+00> : vector<2x8x8xf32>
    %17 = tpu.matmul %16, %14, %cst_10 {dimension_numbers = #tpu.dot_dimension_numbers<[2], [2], [1], [1], [0, 0, 0, 1, 1, 1], [0], [0]>} : vector<2x8x128xf32>, vector<2x8x128xf32>, vector<2x8x8xf32> -> vector<2x8x8xf32>
    "tpu.trace_stop"() : () -> ()
    %c0_11 = arith.constant 0 : index
    %c0_12 = arith.constant 0 : index
    %c0_13 = arith.constant 0 : index
    %18 = vector.load %arg7[%c0_11, %c0_12, %c0_13] : memref<2x8x1xf32, #tpu.memory_space<vmem>>, vector<2x8x1xf32>
    %cst_14 = arith.constant 0.176776692 : f32
    %19 = vector.broadcast %cst_14 : f32 to vector<2x8x1xf32>
    %20 = arith.mulf %18, %19 : vector<2x8x1xf32>
    %21 = vector.broadcast %20 : vector<2x8x1xf32> to vector<2x8x8xf32>
    %22 = arith.mulf %17, %21 : vector<2x8x8xf32>
    %c0_15 = arith.constant 0 : index
    %c0_16 = arith.constant 0 : index
    %c0_17 = arith.constant 0 : index
    %23 = vector.load %arg8[%c0_15, %c0_16, %c0_17] : memref<2x8x1xf32, #tpu.memory_space<vmem>>, vector<2x8x1xf32>
    %cst_18 = arith.constant dense<0xFF800000> : vector<2x8xf32>
    %24 = vector.multi_reduction <maximumf>, %22, %cst_18 [2] : vector<2x8x8xf32> to vector<2x8xf32>
    %25 = vector.shape_cast %24 : vector<2x8xf32> to vector<2x8x1xf32>
    %26 = arith.maximumf %23, %25 : vector<2x8x1xf32>
    %c0_19 = arith.constant 0 : index
    %c0_20 = arith.constant 0 : index
    %c0_21 = arith.constant 0 : index
    %27 = vector.load %arg8[%c0_19, %c0_20, %c0_21] : memref<2x8x1xf32, #tpu.memory_space<vmem>>, vector<2x8x1xf32>
    %28 = arith.subf %27, %26 : vector<2x8x1xf32>
    %29 = math.exp %28 : vector<2x8x1xf32>
    %30 = vector.broadcast %26 : vector<2x8x1xf32> to vector<2x8x8xf32>
    %31 = arith.subf %22, %30 : vector<2x8x8xf32>
    %32 = math.exp %31 : vector<2x8x8xf32>
    %c0_22 = arith.constant 0 : index
    %c0_23 = arith.constant 0 : index
    %c0_24 = arith.constant 0 : index
    %33 = vector.load %arg9[%c0_22, %c0_23, %c0_24] : memref<2x8x1xf32, #tpu.memory_space<vmem>>, vector<2x8x1xf32>
    %34 = arith.mulf %29, %33 : vector<2x8x1xf32>
    %cst_25 = arith.constant dense<0.000000e+00> : vector<2x8xf32>
    %35 = vector.multi_reduction <add>, %32, %cst_25 [2] : vector<2x8x8xf32> to vector<2x8xf32>
    %36 = vector.shape_cast %35 : vector<2x8xf32> to vector<2x8x1xf32>
    %37 = arith.addf %34, %36 : vector<2x8x1xf32>
    %c0_26 = arith.constant 0 : index
    %c0_27 = arith.constant 0 : index
    %c0_28 = arith.constant 0 : index
    %38 = vector.load %arg9[%c0_26, %c0_27, %c0_28] : memref<2x8x1xf32, #tpu.memory_space<vmem>>, vector<2x8x1xf32>
    tpu.vector_store %arg9[%c0_26, %c0_27, %c0_28], %37 {strides = array<i32>} : memref<2x8x1xf32, #tpu.memory_space<vmem>>, vector<2x8x1xf32>,
    %c0_29 = arith.constant 0 : index
    %c0_30 = arith.constant 0 : index
    %c0_31 = arith.constant 0 : index
    %39 = vector.load %arg10[%c0_29, %c0_30, %c0_31] : memref<2x8x128xf32, #tpu.memory_space<vmem>>, vector<2x8x128xf32>
    %40 = vector.broadcast %29 : vector<2x8x1xf32> to vector<2x8x128xf32>
    %41 = arith.mulf %40, %39 : vector<2x8x128xf32>
    "tpu.trace_start"() <{level = 10 : i32, message = "bqk,bkd->bqd"}> : () -> ()
    %cst_32 = arith.constant dense<0.000000e+00> : vector<2x8x128xf32>
    %42 = tpu.matmul %32, %15, %cst_32 {dimension_numbers = #tpu.dot_dimension_numbers<[2], [1], [1], [2], [0, 0, 0, 1, 1, 2], [0], [0]>} : vector<2x8x8xf32>, vector<2x8x128xf32>, vector<2x8x128xf32> -> vector<2x8x128xf32>
    "tpu.trace_stop"() : () -> ()
    %43 = arith.addf %41, %42 : vector<2x8x128xf32>
    %c0_33 = arith.constant 0 : index
    %c0_34 = arith.constant 0 : index
    %c0_35 = arith.constant 0 : index
    %44 = vector.load %arg10[%c0_33, %c0_34, %c0_35] : memref<2x8x128xf32, #tpu.memory_space<vmem>>, vector<2x8x128xf32>
    tpu.vector_store %arg10[%c0_33, %c0_34, %c0_35], %43 {strides = array<i32>} : memref<2x8x128xf32, #tpu.memory_space<vmem>>, vector<2x8x128xf32>,
    %c0_36 = arith.constant 0 : index
    %c0_37 = arith.constant 0 : index
    %c0_38 = arith.constant 0 : index
    %45 = vector.load %arg8[%c0_36, %c0_37, %c0_38] : memref<2x8x1xf32, #tpu.memory_space<vmem>>, vector<2x8x1xf32>
    tpu.vector_store %arg8[%c0_36, %c0_37, %c0_38], %26 {strides = array<i32>} : memref<2x8x1xf32, #tpu.memory_space<vmem>>, vector<2x8x1xf32>,
    %c0_i32_39 = arith.constant 0 : i32
    %46 = arith.cmpi eq, %arg1, %c0_i32_39 : i32
    %47 = arith.extui %46 : i1 to i32
    %c0_i32_40 = arith.constant 0 : i32
    %48 = arith.cmpi ne, %47, %c0_i32_40 : i32
    scf.if %48 {
      %c0_41 = arith.constant 0 : index
      %c0_42 = arith.constant 0 : index
      %c0_43 = arith.constant 0 : index
      %49 = vector.load %arg9[%c0_41, %c0_42, %c0_43] : memref<2x8x1xf32, #tpu.memory_space<vmem>>, vector<2x8x1xf32>
      %50 = tpu.reciprocal %49 {approx = true} : vector<2x8x1xf32> -> vector<2x8x1xf32>
      %c0_44 = arith.constant 0 : index
      %c0_45 = arith.constant 0 : index
      %c0_46 = arith.constant 0 : index
      %51 = vector.load %arg10[%c0_44, %c0_45, %c0_46] : memref<2x8x128xf32, #tpu.memory_space<vmem>>, vector<2x8x128xf32>
      %52 = vector.broadcast %50 : vector<2x8x1xf32> to vector<2x8x128xf32>
      %53 = arith.mulf %51, %52 : vector<2x8x128xf32>
      %c0_47 = arith.constant 0 : index
      %c0_48 = arith.constant 0 : index
      %c0_49 = arith.constant 0 : index
      %54 = vector.load %arg5[%c0_47, %c0_48, %c0_49] : memref<2x8x128xf32, #tpu.memory_space<vmem>>, vector<2x8x128xf32>
      tpu.vector_store %arg5[%c0_47, %c0_48, %c0_49], %53 {strides = array<i32>} : memref<2x8x128xf32, #tpu.memory_space<vmem>>, vector<2x8x128xf32>,
    } else {
    }
    return
  }
  func.func @transform_0(%arg0: i32, %arg1: i32) -> (i32, i32, i32) {
    %c0_i32 = arith.constant 0 : i32
    %c0_i32_0 = arith.constant 0 : i32
    %c0_i32_1 = arith.constant 0 : i32
    return %arg0, %c0_i32, %c0_i32_0 : i32, i32, i32
  }
  func.func @transform_1(%arg0: i32, %arg1: i32) -> (i32, i32, i32) {
    %c0_i32 = arith.constant 0 : i32
    %c0_i32_0 = arith.constant 0 : i32
    %c0_i32_1 = arith.constant 0 : i32
    return %arg0, %c0_i32, %c0_i32_0 : i32, i32, i32
  }
  func.func @transform_2(%arg0: i32, %arg1: i32) -> (i32, i32) {
    %c0_i32 = arith.constant 0 : i32
    %c0_i32_0 = arith.constant 0 : i32
    %c0_i32_1 = arith.constant 0 : i32
    return %c0_i32, %c0_i32_0 : i32, i32
  }
  func.func @transform_3(%arg0: i32, %arg1: i32) -> (i32, i32, i32) {
    %c0_i32 = arith.constant 0 : i32
    %c0_i32_0 = arith.constant 0 : i32
    %c0_i32_1 = arith.constant 0 : i32
    return %arg0, %c0_i32, %c0_i32_0 : i32, i32, i32
  }
}

</mosaic_0001>

<bundles_post_ra>
// kernel: tpu_custom_call.1
= control target key start
LH: loop header
LB: loop body
LE: loop exit
PB: predicated region body
PF: predicated region fallthrough
CT: control target
= control target key end

     0   :  { %8 = vsyncpa [#allocation8], 0  ;;  %s1148_s0 = inlined_call_operand.hbm [shape: f32[2,8,32], index: 0, kind: input, shape index: {}]   ;;  %s1149_s1 = inlined_call_operand.hbm [shape: f32[2,1,512], index: 1, kind: input, shape index: {}]   ;;  %s1150_s2 = inlined_call_operand.hbm [shape: f32[32,512], index: 2, kind: input, shape index: {}]   ;;  %s1151_s3 = inlined_call_operand.hbm [shape: f32[2,8,128], index: 3, kind: output, shape index: {}]  }
   0x1   :  { %9 = vsyncpa [#allocation11], 0 }
   0x2   :  { %10 = vsyncpa [#allocation9], 0  ;;  %s1050_s12 = smov [#allocation10]  }
   0x3   :  { %s28_s13 = sshll.u32 %s1050_s12, 4  ;;  %s29_s13 = int_to_ptr.vmem [resolvable:$true] %s28_s13 }
   0x4   :  { %s972_s14 = scalar_lea.vmem %s29_s13, 128  ;;  %p977_p1 = scmp.lt.s32.totalorder %s29_s13, %s29_s13 }
   0x5   :  { %p973_p0 = scmp.ne.s32.totalorder %s29_s13, %s972_s14  ;;  %p978_p2 = scmp.lt.s32.totalorder %s972_s14, %s972_s14 }
   0x7   :  { %p979_p3 = por %p978_p2, %p977_p1 }
   0x9   :  { %p980_p4 = pnand %p979_p3, %p973_p0 }
   0xb   :  { %983 = shalt.err (!%p980_p4)
}
   0xc   :  { %s1051_s15 = smov 64   ;;  %s1052_s16 = smov 4  }
   0xd   :  { %34 = dma.hbm_to_vmem [thread:$0]  %s1149_s1, 128, %s29_s13, [#allocation11], %s1051_s15, %s1051_s15, %s1052_s16  }
   0xe   :  { %s1053_s19 = smov [#allocation7]  }
   0xf   :  { %s16_s20 = sshll.u32 %s1053_s19, 4  ;;  %s17_s20 = int_to_ptr.vmem [resolvable:$true] %s16_s20 }
  0x10   :  { %s992_s21 = scalar_lea.vmem %s17_s20, 256  ;;  %p997_p6 = scmp.lt.s32.totalorder %s17_s20, %s17_s20 }
  0x11   :  { %p993_p5 = scmp.ne.s32.totalorder %s17_s20, %s992_s21  ;;  %p998_p7 = scmp.lt.s32.totalorder %s992_s21, %s992_s21 }
  0x13   :  { %p999_p8 = por %p998_p7, %p997_p6 }
  0x15   :  { %p1000_p9 = pnand %p999_p8, %p993_p5 }
  0x17   :  { %1003 = shalt.err (!%p1000_p9)
}
  0x18   :  { %s1054_s22 = smov 128   ;;  %s1055_s23 = smov 8  }
  0x19   :  { %22 = dma.hbm_to_vmem [thread:$0]  %s1148_s0, 256, %s17_s20, [#allocation8], %s1054_s22, %s1054_s22, %s1055_s23  }
  0x1a   :  { %s1056_s1 = smov [#allocation12]  }
  0x1b   :  { %s40_s26 = sshll.u32 %s1056_s1, 4  ;;  %s41_s26 = int_to_ptr.vmem [resolvable:$true] %s40_s26 }
  0x1c   :  { %s1012_s27 = scalar_lea.vmem %s41_s26, 2048  ;;  %p1017_p11 = scmp.lt.s32.totalorder %s41_s26, %s41_s26 }
  0x1d   :  { %p1013_p10 = scmp.ne.s32.totalorder %s41_s26, %s1012_s27  ;;  %p1018_p12 = scmp.lt.s32.totalorder %s1012_s27, %s1012_s27 }
  0x1f   :  { %p1019_p13 = por %p1018_p12, %p1017_p11 }
  0x21   :  { %p1020_p0 = pnand %p1019_p13, %p1013_p10 }
  0x23   :  { %1023 = shalt.err (!%p1020_p0)
}
  0x24   :  { %s1057_s28 = smov 512   ;;  %s1058_s29 = smov 32  }
  0x25   :  { %46 = dma.hbm_to_vmem [thread:$0]  %s1150_s2, 2048, %s41_s26, [#allocation11], %s1057_s28, %s1057_s28, %s1058_s29  }
  0x26   :  { %1044 = dma.done.wait [#allocation8], 256  }
  0x27   :  { %1045 = vsyncadd [#allocation8], 4294967040 }
  0x28   :  { %1046 = dma.done.wait [#allocation11], 2176  }
  0x29   :  { %1047 = vsyncadd [#allocation11], 4294965120  ;;  %v1059_v0 = vmov 0.0   ;;  %v69_v1 = vld [vmem:[#allocation12 + $0x68] sm:$0xff]  ;;  %v68_v2 = vld [vmem:[#allocation12 + $0x60] sm:$0xff]  ;;  %vm78_vm0 = vcmask 261120   ;;  %v239_v20 = vlaneseq }
  0x2a   :  { %149 = vmatprep.mubr.f32.mxu0 %v1059_v0  ;;  %224 = vmatprep.mubr.f32.mxu1 %v1059_v0  ;;  %v65_v3 = vld [vmem:[#allocation12 + $0x48] sm:$0xff]  ;;  %v64_v4 = vld [vmem:[#allocation12 + $0x40] sm:$0xff]  ;;  %v71_v7 = vld [vmem:[#allocation12 + $0x78] sm:$0xff]  ;;  %vm1060_vm1 = vmmov 0   ;;  %vm277_vm2 = vcmask 7168   ;;  %v1061_v19 = vmov 0  }
  0x2b   :  { %109 = vmatprep.subr.mxu0 %v69_v1  ;;  %v61_v5 = vld [vmem:[#allocation12 + $0x28] sm:$0xff]  ;;  %v60_v6 = vld [vmem:[#allocation12 + $0x20] sm:$0xff]  ;;  %v70_v8 = vld [vmem:[#allocation12 + $0x70] sm:$0xff]  ;;  %184 = vmatprep.subr.mxu1 %v71_v7  ;;  %282 = vst.msk [vmem:[#allocation5] sm:$0xff] %vm277_vm2, %v1059_v0  ;;  %v240_v22 = vshrl.u32 %v239_v20, 7  ;;  %vm635_vm3 = vcmask 64512  }
  0x2c   :  { %110 = vmatpush1.msra.mxu0 %v68_v2  ;;  %v57_v9 = vld [vmem:[#allocation12 + $0x8] sm:$0xff]  ;;  %v67_v10 = vld [vmem:[#allocation12 + $0x58] sm:$0xff]  ;;  %v66_v11 = vld [vmem:[#allocation12 + $0x50] sm:$0xff]  ;;  %185 = vmatpush1.msra.mxu1 %v70_v8  ;;  %283 = vst.msk [vmem:[#allocation5 + $0x8] sm:$0xff] %vm277_vm2, %v1059_v0  ;;  %s1063_s0 = smov [#allocation13]  }
  0x2d   :  { %111 = vmatprep.subr.mxu0 %v65_v3  ;;  %v56_v12 = vld [vmem:[#allocation12] sm:$0xff]  ;;  %v63_v13 = vld [vmem:[#allocation12 + $0x38] sm:$0xff]  ;;  %v76_v14 = vld [vmem:[#allocation7] sm:$0xff]  ;;  %186 = vmatprep.subr.mxu1 %v67_v10  ;;  %v245_v24 = vsub.s32 3, %v240_v22  ;;  %v453_v25 = vsub.s32 1, %v240_v22  ;;  %v241_v29 = vsub.s32 0, %v240_v22 }
  0x2e   :  { %112 = vmatpush1.msra.mxu0 %v64_v4  ;;  %187 = vmatpush1.msra.mxu1 %v66_v11  ;;  %v62_v15 = vld [vmem:[#allocation12 + $0x30] sm:$0xff]  ;;  %v59_v16 = vld [vmem:[#allocation12 + $0x18] sm:$0xff]  ;;  %v457_v42 = vsub.s32 2, %v240_v22  ;;  %s875_s2 = sshll.u32 %s1063_s0, 4  ;;  %s876_s2 = int_to_ptr.vmem [resolvable:$true] %s875_s2 }
  0x2f   :  { %113 = vmatprep.subr.mxu0 %v61_v5  ;;  %188 = vmatprep.subr.mxu1 %v63_v13  ;;  %v77_v17 = vld [vmem:[#allocation7 + $0x8] sm:$0xff]  ;;  %v447_v27 = vld [vmem:[#allocation10] sm:$0xf]  ;;  %v448_v35 = vld [vmem:[#allocation10 + $0x4] sm:$0xf]  ;;  %s1024_s5 = scalar_lea.vmem %s876_s2, 256  ;;  %p1029_p2 = scmp.lt.s32.totalorder %s876_s2, %s876_s2 }
  0x30   :  { %114 = vmatpush1.msra.mxu0 %v60_v6  ;;  %189 = vmatpush1.msra.mxu1 %v62_v15  ;;  %v58_v18 = vld [vmem:[#allocation12 + $0x10] sm:$0xff]  ;;  %v235_v28 = vld [vmem:[#allocation10] sm:$0xf]  ;;  %v454_v32 = vrot.slane %v447_v27, %v453_v25  ;;  %v236_v36 = vld [vmem:[#allocation10 + $0x4] sm:$0xf]  ;;  %v462_v44 = vrot.slane %v448_v35, %v453_v25  ;;  %v458_v53 = vrot.slane %v447_v27, %v457_v42  ;;  %p1025_p1 = scmp.ne.s32.totalorder %s876_s2, %s1024_s5  ;;  %p1030_p3 = scmp.lt.s32.totalorder %s1024_s5, %s1024_s5 }
  0x31   :  { %115 = vmatprep.subr.mxu0 %v57_v9  ;;  %190 = vmatprep.subr.mxu1 %v59_v16  ;;  %v246_v31 = vrot.slane %v235_v28, %v245_v24  ;;  %v242_v38 = vrot.slane %v235_v28, %v241_v29  ;;  %v254_v41 = vrot.slane %v236_v36, %v245_v24 }
  0x32   :  { %116 = vmatpush1.msra.mxu0 %v56_v12  ;;  %191 = vmatpush1.msra.mxu1 %v58_v18  ;;  %v250_v48 = vrot.slane %v236_v36, %v241_v29  ;;  %p1031_p4 = por %p1030_p3, %p1029_p2 }
  0x33   :  { %888 = vmatmul.mubr.msk.f32.vlgmr.msra.gmra.mxu0 %vm78_vm0, %v76_v14  ;;  %321 = vmatprep.subr.mxu0 %v69_v1 }
  0x34   :  { %322 = vmatpush1.msra.mxu0 %v68_v2  ;;  %154 = vmatprep.mubr.f32.mxu0 %v1059_v0  ;;  %p1032_p5 = pnand %p1031_p4, %p1025_p1 }
  0x35   :  { %323 = vmatprep.subr.mxu0 %v65_v3  ;;  %890 = vmatmul.mubr.msk.f32.vlgmr.msra.gmra.mxu1 %vm78_vm0, %v76_v14 }
  0x36   :  { %324 = vmatpush1.msra.mxu0 %v64_v4  ;;  %229 = vmatprep.mubr.f32.mxu1 %v1059_v0  ;;  %v466_v4 = vrot.slane %v448_v35, %v457_v42 }
  0x37   :  { %889 = vmatmul.mubr.msk.f32.gmra.mxu0 %vm78_vm0, %v77_v17  ;;  %325 = vmatprep.subr.mxu0 %v61_v5 }
  0x38   :  { %326 = vmatpush1.msra.mxu0 %v60_v6  ;;  %361 = vmatprep.mubr.f32.mxu0 %v1059_v0 }
  0x39   :  { %327 = vmatprep.subr.mxu0 %v57_v9  ;;  %396 = vmatprep.subr.mxu1 %v71_v7 }
  0x3a   :  { %328 = vmatpush1.msra.mxu0 %v56_v12  ;;  %397 = vmatpush1.msra.mxu1 %v70_v8 }
  0x3b   :  { %894 = vmatmul.mubr.msk.f32.vlgmr.msra.gmra.mxu0 %vm78_vm0, %v76_v14  ;;  %908 = vmatprep.subr.mxu0 %v1059_v0 }
  0x3c   :  { %366 = vmatprep.mubr.f32.mxu0 %v1059_v0  ;;  %891 = vmatmul.mubr.msk.f32.gmra.mxu1 %vm78_vm0, %v77_v17 }
  0x3d   :  { %398 = vmatprep.subr.mxu1 %v67_v10  ;;  %436 = vmatprep.mubr.f32.mxu1 %v1059_v0  ;;  %v1062_v10 = vmov -inf  }
  0x3e   :  { %399 = vmatpush1.msra.mxu1 %v66_v11  ;;  %942 = vset.pattern.permute.xlu0 %v1061_v19  ;;  %280 = vst.msk [vmem:[#allocation4] sm:$0xff] %vm277_vm2, %v1062_v10  ;;  %281 = vst.msk [vmem:[#allocation4 + $0x8] sm:$0xff] %vm277_vm2, %v1062_v10 }
  0x3f   :  { %895 = vmatmul.mubr.msk.f32.gmra.mxu0 %vm78_vm0, %v77_v17  ;;  %400 = vmatprep.subr.mxu1 %v63_v13 }
  0x40   :  { %401 = vmatpush1.msra.mxu1 %v62_v15  ;;  %910 = vmatprep.mubr.msk.f32.mxu0 %vm1060_vm1, %v1059_v0 }
  0x41   :  { %402 = vmatprep.subr.mxu1 %v59_v16  ;;  %943 = vset.pattern.permute.xlu1 %v1061_v19 }
  0x42   :  { %403 = vmatpush1.msra.mxu1 %v58_v18 }
  0x43   :  { %896 = vmatmul.mubr.msk.f32.vlgmr.msra.gmra.mxu1 %vm78_vm0, %v76_v14  ;;  %913 = vmatprep.subr.mxu1 %v1059_v0 }
  0x44   :  { %441 = vmatprep.mubr.f32.mxu1 %v1059_v0 }
  0x45   :  { %v634_v24 = vld [vmem:[#allocation4 + $0x8] sm:$0xff] }
  0x47   :  { %897 = vmatmul.mubr.msk.f32.gmra.mxu1 %vm78_vm0, %v77_v17 }
  0x48   :  { %915 = vmatprep.mubr.msk.f32.mxu1 %vm1060_vm1, %v1059_v0 }
  0xf3   :  { %v151_v21 = vpop.f32.mrf.mxu0 }
  0xf4   :  { %v259_v50 = vadd.f32 %v242_v38, %v151_v21  ;;  %v633_v21 = vld [vmem:[#allocation4] sm:$0xff] }
  0xf5   :  { %v153_v23 = vpop.f32.mrf.mxu0  ;;  %v226_v33 = vpop.f32.mrf.mxu1 }
  0xf7   :  { %v156_v26 = vpop.f32.mrf.mxu0  ;;  %v227_v37 = vpop.f32.mrf.mxu1 }
  0xf8   :  { %v260_v40 = vadd.f32 %v246_v31, %v227_v37  ;;  %v261_v57 = vadd.f32 %v250_v48, %v156_v26 }
  0xf9   :  { %v158_v30 = vpop.f32.mrf.mxu0 }
  0xfa   :  { %v892_v47 = vmul.f32 -1.442695, %v260_v40 }
  0xfb   :  { %v363_v34 = vpop.f32.mrf.mxu0 }
  0xfc   :  { %v231_v45 = vpop.f32.mrf.mxu1  ;;  %944 = vpow2.f32 %v892_v47 }
  0xfd   :  { %v364_v39 = vpop.f32.mrf.mxu0 }
  0xfe   :  { %v471_v43 = vadd.f32 %v454_v32, %v364_v39  ;;  %v232_v49 = vpop.f32.mrf.mxu1 }
  0xff   :  { %v368_v46 = vpop.f32.mrf.mxu0  ;;  %v262_v52 = vadd.f32 %v254_v41, %v232_v49 }
 0x100   :  { %909 = vmatpush3.xpose.msra.mxu0 %v471_v43  ;;  %v666_v43 = vld [vmem:[#allocation5] sm:$0xff]  ;;  %v667_v46 = vld [vmem:[#allocation5 + $0x8] sm:$0xff] }
 0x101   :  { %v369_v51 = vpop.f32.mrf.mxu0  ;;  %918 = vmatprep.subr.mxu0 %v1059_v0  ;;  %v893_v55 = vmul.f32 -1.442695, %v262_v52 }
 0x102   :  { %v473_v54 = vadd.f32 %v462_v44, %v369_v51 }
 0x103   :  { %911 = vmatmul.mubr.f32.vlgmr.msra.gmra.mxu0 %v259_v50  ;;  %v438_v56 = vpop.f32.mrf.mxu1  ;;  %946 = vpow2.f32 %v893_v55 }
 0x104   :  { %914 = vmatpush3.xpose.msra.mxu1 %v473_v54  ;;  %920 = vmatprep.mubr.msk.f32.mxu0 %vm1060_vm1, %v1059_v0  ;;  %v472_v58 = vadd.f32 %v458_v53, %v438_v56 }
 0x105   :  { %923 = vmatprep.subr.mxu1 %v1059_v0  ;;  %v440_v59 = vpop.f32.mrf.mxu1 }
 0x106   :  { %919 = vmatpush3.msra.mxu0 %v472_v58 }
 0x107   :  { %916 = vmatmul.mubr.f32.vlgmr.msra.gmra.mxu1 %v261_v57  ;;  %v443_v3 = vpop.f32.mrf.mxu1 }
 0x108   :  { %925 = vmatprep.mubr.msk.f32.mxu1 %vm1060_vm1, %v1059_v0  ;;  %v474_v6 = vadd.f32 %v466_v4, %v443_v3 }
 0x109   :  { %v945_v60 = vpop.eup %944  ;;  %v445_v7 = vpop.f32.mrf.mxu1 }
 0x10a   :  { %v271_v61 = vadd.f32 1.0, %v945_v60  ;;  %924 = vmatpush3.msra.mxu1 %v474_v6 }
 0x10c   :  { %948 = vrcp.f32 %v271_v61 }
 0x110   :  { %v947_v62 = vpop.eup %946 }
 0x111   :  { %v272_v63 = vadd.f32 1.0, %v947_v62 }
 0x113   :  { %950 = vrcp.f32 %v272_v63 }
 0x119   :  { %v949_v1 = vpop.eup %948 }
 0x11a   :  { %278 = vst.msk [vmem:[#allocation3] sm:$0xff] %vm277_vm2, %v949_v1 }
 0x120   :  { %v951_v2 = vpop.eup %950 }
 0x121   :  { %279 = vst.msk [vmem:[#allocation3 + $0x8] sm:$0xff] %vm277_vm2, %v951_v2  ;;  %v617_v5 = vld [vmem:[#allocation3] sm:$0xff] }
 0x122   :  { %v619_v8 = vmul.f32 0.17677669, %v617_v5 }
 0x124   :  { %623 = vperm.xlu0 %942, %v619_v8  }
 0x128   :  { %v618_v0 = vld [vmem:[#allocation3 + $0x8] sm:$0xff] }
 0x129   :  { %v620_v9 = vmul.f32 0.17677669, %v618_v0 }
 0x12b   :  { %628 = vperm.xlu0 %942, %v620_v9  }
 0x19f   :  { %v624_v11 = vpop.permute.xlu0 %623 }
 0x1a6   :  { %v629_v16 = vpop.permute.xlu0 %628 }
 0x1c3   :  { %v543_v12 = vpop.f32.mrf.mxu0 }
 0x1c4   :  { %v631_v13 = vmul.f32 %v624_v11, %v543_v12 }
 0x1c5   :  { %v912_v14 = vpop.f32.mrf.mxu0 }
 0x1c6   :  { %v636_v15 = vsel %vm635_vm3, %v631_v13, -inf }
 0x1c7   :  { %637 = vmax.xlane.f32.xlu1 %v636_v15  ;;  %v613_v17 = vpop.f32.mrf.mxu1 }
 0x1c8   :  { %v632_v18 = vmul.f32 %v629_v16, %v613_v17 }
 0x1c9   :  { %v917_v19 = vpop.f32.mrf.mxu1 }
 0x1ca   :  { %v639_v20 = vsel %vm635_vm3, %v632_v18, -inf }
 0x1cb   :  { %640 = vmax.xlane.f32.xlu1 %v639_v20 }
 0x250   :  { %v638_v22 = vpop.xlane.xlu1 %637 }
 0x251   :  { %v642_v23 = vmax.f32 %v633_v21, %v638_v22 }
 0x253   :  { %v644_v25 = vsub.f32 %v633_v21, %v642_v23  ;;  %845 = vst.msk [vmem:[#allocation4] sm:$0xff] %vm277_vm2, %v642_v23  ;;  %652 = vperm.xlu0 %942, %v642_v23  }
 0x254   :  { %v641_v26 = vpop.xlane.xlu1 %640 }
 0x255   :  { %v643_v27 = vmax.f32 %v634_v24, %v641_v26  ;;  %v646_v40 = vmul.f32 1.442695, %v644_v25 }
 0x257   :  { %v645_v28 = vsub.f32 %v634_v24, %v643_v27  ;;  %846 = vst.msk [vmem:[#allocation4 + $0x8] sm:$0xff] %vm277_vm2, %v643_v27  ;;  %657 = vperm.xlu1 %943, %v643_v27  }
 0x259   :  { %v648_v38 = vmul.f32 1.442695, %v645_v28 }
 0x2ce   :  { %v653_v29 = vpop.permute.xlu0 %652 }
 0x2cf   :  { %v660_v30 = vsub.f32 %v631_v13, %v653_v29 }
 0x2d1   :  { %v662_v31 = vmul.f32 1.442695, %v660_v30 }
 0x2d2   :  { %v658_v32 = vpop.permute.xlu1 %657 }
 0x2d3   :  { %952 = vpow2.f32 %v662_v31  ;;  %v661_v33 = vsub.f32 %v632_v18, %v658_v32 }
 0x2d5   :  { %v664_v34 = vmul.f32 1.442695, %v661_v33 }
 0x2d7   :  { %954 = vpow2.f32 %v664_v34 }
 0x2d8   :  { %956 = vpow2.f32 %v648_v38 }
 0x2d9   :  { %958 = vpow2.f32 %v646_v40 }
 0x2e0   :  { %v953_v35 = vpop.eup %952 }
 0x2e1   :  { %921 = vmatmul.mubr.msk.f32.vlgmr.msra.gmra.mxu0 %vm635_vm3, %v953_v35  ;;  %v670_v36 = vsel %vm635_vm3, %v953_v35, 0.0 }
 0x2e2   :  { %671 = vadd.xlane.f32.xlu0 %v670_v36 }
 0x2e4   :  { %v955_v37 = vpop.eup %954 }
 0x2e5   :  { %926 = vmatmul.mubr.msk.f32.vlgmr.msra.gmra.mxu1 %vm635_vm3, %v955_v37  ;;  %v673_v39 = vsel %vm635_vm3, %v955_v37, 0.0  ;;  %v957_v41 = vpop.eup %956 }
 0x2e6   :  { %674 = vadd.xlane.f32.xlu1 %v673_v39  ;;  %v959_v42 = vpop.eup %958  ;;  %v669_v48 = vmul.f32 %v957_v41, %v667_v46 }
 0x2e7   :  { %v668_v44 = vmul.f32 %v959_v42, %v666_v43 }
 0x2f7   :  { %690 = vperm.xlu1 %943, %v957_v41  }
 0x2f8   :  { %685 = vperm.xlu0 %942, %v959_v42  }
 0x36b   :  { %v672_v45 = vpop.xlane.xlu0 %671 }
 0x36c   :  { %v676_v47 = vadd.f32 %v672_v45, %v668_v44 }
 0x36e   :  { %679 = vst.msk [vmem:[#allocation5] sm:$0xff] %vm277_vm2, %v676_v47 }
 0x36f   :  { %v675_v49 = vpop.xlane.xlu1 %674 }
 0x370   :  { %v677_v50 = vadd.f32 %v675_v49, %v669_v48 }
 0x372   :  { %680 = vst.msk [vmem:[#allocation5 + $0x8] sm:$0xff] %vm277_vm2, %v677_v50 }
 0x373   :  { %v686_v59 = vpop.permute.xlu0 %685  ;;  %v691_v61 = vpop.permute.xlu1 %690 }
 0x374   :  { %v693_v60 = vmul.f32 0.0, %v686_v59  ;;  %v694_v1 = vmul.f32 0.0, %v691_v61 }
 0x375   :  { %v850_v51 = vld [vmem:[#allocation5] sm:$0xff] }
 0x376   :  { %960 = vrcp.f32 %v850_v51 }
 0x379   :  { %v851_v52 = vld [vmem:[#allocation5 + $0x8] sm:$0xff] }
 0x37a   :  { %962 = vrcp.f32 %v851_v52 }
 0x383   :  { %v961_v53 = vpop.eup %960 }
 0x384   :  { %858 = vperm.xlu0 %942, %v961_v53  }
 0x387   :  { %v963_v54 = vpop.eup %962 }
 0x388   :  { %863 = vperm.xlu0 %942, %v963_v54  }
 0x3a1   :  { %v764_v55 = vpop.f32.mrf.mxu0 }
 0x3a2   :  { %v841_v62 = vadd.f32 %v764_v55, %v693_v60 }
 0x3a3   :  { %v922_v56 = vpop.f32.mrf.mxu0 }
 0x3a5   :  { %v837_v57 = vpop.f32.mrf.mxu1 }
 0x3a6   :  { %v842_v3 = vadd.f32 %v837_v57, %v694_v1 }
 0x3a7   :  { %v927_v58 = vpop.f32.mrf.mxu1 }
 0x3ff   :  { %v859_v63 = vpop.permute.xlu0 %858 }
 0x400   :  { %v866_v2 = vmul.f32 %v859_v63, %v841_v62 }
 0x402   :  { %868 = vst [vmem:[#allocation13] sm:$0xff] %v866_v2 }
 0x403   :  { %v864_v4 = vpop.permute.xlu0 %863 }
 0x404   :  { %v867_v5 = vmul.f32 %v864_v4, %v842_v3 }
 0x406   :  { %869 = vst [vmem:[#allocation13 + $0x8] sm:$0xff] %v867_v5 }
 0x407   :  { %1035 = shalt.err (!%p1032_p5)
}
 0x408   :  { %881 = dma.vmem_to_hbm [thread:$0]  %s876_s2, 256, %s1151_s3, [#allocation9], %s1054_s22, %s1054_s22, %s1055_s23  }
 0x409   :  { %1048 = dma.done.wait [#allocation9], 256  }
 0x40a   :  { %1049 = vsyncadd [#allocation9], 4294967040 }
 0x40b   :  { %885 = vsyncpa [#allocation8], 1 }
 0x40c   :  { %886 = vsyncpa [#allocation11], 1 }
 0x40d   :  { %887 = vsyncpa [#allocation9], 1 }

</bundles_post_ra>
